<compile_context>
chip_gen: v6e
topology: v6e:2x2x1
jax: 0.10.0
libtpu: 0.0.40
codegen_flags: <defaults>
</compile_context>

<pallas_src>
import jax
import jax.numpy as jnp
from jax.experimental import pallas as pl
from jax.experimental.pallas import tpu as pltpu


# ------------------------------ fused kernel -------------------------------- #

def ealstm_fused_kernel(xd_ref, xs_ref, wih_ref, whh_ref, wsh_ref, b_ref, bs_ref,
                        wp_ref, bp_ref, wprt_ref, bpr_ref, out_ref, hseq_sc):
    """EA-LSTM recurrence + predict_linear + projection, all in one kernel call."""
    B, S, Din = xd_ref.shape
    H = whh_ref.shape[0]

    # ---- prologue: everything that does not depend on the recurrence ----
    # static input gate: i = sigmoid(x_s @ W_sh + bias_s)                     (B, H)
    i_gate = jax.nn.sigmoid(
        jnp.dot(xs_ref[...], wsh_ref[...], preferred_element_type=jnp.float32)
        + bs_ref[...])

    # hoisted input projection + bias: xw[b, t, :] = x_d[b, t] @ W_ih + b   (B, S, 3H)
    xw = (jnp.dot(xd_ref[...].reshape(B * S, Din), wih_ref[...],
                  preferred_element_type=jnp.float32)
          + b_ref[...]).reshape(B, S, 3 * H)

    whh = whh_ref[...]

    h = jnp.zeros((B, H), jnp.float32)
    c = jnp.zeros((B, H), jnp.float32)

    # ---- recurrence: fully unrolled (S is small and static) ----
    # per step: gates = h @ W_hh + (x_t @ W_ih + b)   -> f, o, g chunks
    for t in range(S):
        gates = jnp.dot(h, whh, preferred_element_type=jnp.float32) + xw[:, t, :]
        f = gates[:, 0 * H:1 * H]
        o = gates[:, 1 * H:2 * H]
        g = gates[:, 2 * H:3 * H]
        c = jax.nn.sigmoid(f) * c + i_gate * jnp.tanh(g)
        h = jax.nn.sigmoid(o) * jnp.tanh(c)
        hseq_sc[t] = h                                           # (B, H) into (S, B, H)

    # ---- head: predict_linear over seq axis + projection over hidden ----
    # dropout is identity in eval mode.
    wp = wp_ref[...]        # (P, S)
    bp = bp_ref[...]        # (P, 1)
    wprt = wprt_ref[...]    # (H, C)
    bpr = bpr_ref[...]      # (1, C)
    for b in range(B):
        hb = hseq_sc[:, b, :]                                                   # (S, H)
        # tmp[p, h] = sum_s Wp[p, s] * h_n[b, s, h] + bp[p]
        tmp = jnp.dot(wp, hb, preferred_element_type=jnp.float32) + bp          # (P, H)
        # out[p, c] = sum_h tmp[p, h] * Wproj[c, h] + bproj[c]
        ob = jnp.dot(tmp, wprt, preferred_element_type=jnp.float32) + bpr       # (P, C)
        out_ref[b] = ob.astype(out_ref.dtype)


# -------------------------------- wrapper ------------------------------------ #

def ealstm_forward(x_d, numeric_s, climate_s, lc_s, params):
    B, S, Din = x_d.shape
    H = params["weight_hh"].shape[0]
    P = params["predict_w"].shape[0]
    Cout = params["proj_w"].shape[0]

    # ---- glue: embedding lookups + static feature concat (plain JAX gathers) ----
    clim = params["climate_embed"][climate_s[:, 0]]            # (B, 5)
    lc = params["lc_embed"][lc_s].reshape(B, -1)               # (B, 15)
    x_s = jnp.concatenate([numeric_s, clim, lc], axis=1)       # (B, Dstat)

    bias2 = params["bias"].reshape(1, 3 * H)
    bias_s2 = params["bias_s"].reshape(1, H)
    bp2 = params["predict_b"].reshape(P, 1)
    wpr_t = params["proj_w"].T                                 # (H, Cout)
    bpr2 = params["proj_b"].reshape(1, Cout)

    vmem_spec = lambda: pl.BlockSpec(memory_space=pltpu.MemorySpace.VMEM)

    out = pl.pallas_call(
        ealstm_fused_kernel,
        out_shape=jax.ShapeDtypeStruct((B, P, Cout), jnp.float32),
        in_specs=[vmem_spec() for _ in range(11)],
        out_specs=vmem_spec(),
        scratch_shapes=[pltpu.VMEM((S, B, H), jnp.float32)],   # per-step hidden states
    )(x_d, x_s, params["weight_ih"], params["weight_hh"], params["weight_sh"],
      bias2, bias_s2, params["predict_w"], bp2, wpr_t, bpr2)
    return out


# --------------------------- parameter init --------------------------------- #

def init_params(key, enc_in, stat_in, hidden, seq_len, pred_len, c_out):
    ks = jax.random.split(key, 8)
    orth = jax.nn.initializers.orthogonal()

    weight_ih = orth(ks[0], (enc_in, 3 * hidden), jnp.float32)
    weight_sh = orth(ks[1], (stat_in, hidden), jnp.float32)
    weight_hh = jnp.tile(jnp.eye(hidden, dtype=jnp.float32), (1, 3))   # eye.repeat(1, 3)
    bias = jnp.zeros((3 * hidden,), jnp.float32)
    bias_s = jnp.zeros((hidden,), jnp.float32)

    b_p = 1.0 / (seq_len ** 0.5)
    predict_w = jax.random.uniform(ks[2], (pred_len, seq_len), jnp.float32, -b_p, b_p)
    predict_b = jax.random.uniform(ks[3], (pred_len,), jnp.float32, -b_p, b_p)

    b_pr = 1.0 / (hidden ** 0.5)
    proj_w = jax.random.uniform(ks[4], (c_out, hidden), jnp.float32, -b_pr, b_pr)
    proj_b = jax.random.uniform(ks[5], (c_out,), jnp.float32, -b_pr, b_pr)

    climate_embed = jax.random.normal(ks[6], (26, 5), jnp.float32)
    lc_embed = jax.random.normal(ks[7], (27, 5), jnp.float32)

    return dict(weight_ih=weight_ih, weight_hh=weight_hh, weight_sh=weight_sh,
                bias=bias, bias_s=bias_s,
                predict_w=predict_w, predict_b=predict_b,
                proj_w=proj_w, proj_b=proj_b,
                climate_embed=climate_embed, lc_embed=lc_embed)


# --------------------------------- main -------------------------------------- #

if __name__ == "__main__":
    # configs: enc_in=4, numeric_stat_in=6 (=> input_size_stat=26), d_model=32,
    #          seq_len=8, pred_len=4, c_out=4, dropout=eval-identity
    B, S, Din = 2, 8, 4
    numeric_stat_in = 6
    H = 32
    pred_len = 4
    c_out = 4

    key = jax.random.PRNGKey(0)
    k_par, k_xd, k_ns, k_cs, k_lc = jax.random.split(key, 5)

    params = init_params(k_par, Din, numeric_stat_in + 5 + 5 * 3, H, S, pred_len, c_out)

    x_d = jax.random.normal(k_xd, (B, S, Din), jnp.float32)
    numeric_s = jax.random.normal(k_ns, (B, numeric_stat_in), jnp.float32)
    climate_s = jax.random.randint(k_cs, (B, 1), 0, 26, jnp.int32)
    lc_s = jax.random.randint(k_lc, (B, 3), 0, 27, jnp.int32)

    fwd = jax.jit(ealstm_forward)
    out = fwd(x_d, numeric_s, climate_s, lc_s, params)
    out = jax.block_until_ready(out)
    assert out.shape == (B, pred_len, c_out), out.shape
    assert out.dtype == jnp.float32
    print("KERNEL_OK")
</pallas_src>

<mosaic_0001>
module attributes {stable_mosaic.version = 11 : i64} {
  func.func @ealstm_fused_kernel(%arg0: memref<2x8x4xf32, #tpu.memory_space<vmem>>, %arg1: memref<2x26xf32, #tpu.memory_space<vmem>>, %arg2: memref<4x96xf32, #tpu.memory_space<vmem>>, %arg3: memref<32x96xf32, #tpu.memory_space<vmem>>, %arg4: memref<26x32xf32, #tpu.memory_space<vmem>>, %arg5: memref<1x96xf32, #tpu.memory_space<vmem>>, %arg6: memref<1x32xf32, #tpu.memory_space<vmem>>, %arg7: memref<4x8xf32, #tpu.memory_space<vmem>>, %arg8: memref<4x1xf32, #tpu.memory_space<vmem>>, %arg9: memref<32x4xf32, #tpu.memory_space<vmem>>, %arg10: memref<1x4xf32, #tpu.memory_space<vmem>>, %arg11: memref<2x4x4xf32, #tpu.memory_space<vmem>>, %arg12: memref<8x2x32xf32, #tpu.memory_space<vmem>>) attributes {dimension_semantics = [], scalar_prefetch = 0 : i64, scratch_operands = 1 : i64, tpu.core_type = #tpu.core_type<tc>} {
    %c0 = arith.constant 0 : index
    %c0_0 = arith.constant 0 : index
    %0 = vector.load %arg1[%c0, %c0_0] : memref<2x26xf32, #tpu.memory_space<vmem>>, vector<2x26xf32>
    %c0_1 = arith.constant 0 : index
    %c0_2 = arith.constant 0 : index
    %1 = vector.load %arg4[%c0_1, %c0_2] : memref<26x32xf32, #tpu.memory_space<vmem>>, vector<26x32xf32>
    %cst = arith.constant dense<0.000000e+00> : vector<2x32xf32>
    %2 = tpu.matmul %0, %1, %cst {dimension_numbers = #tpu.dot_dimension_numbers<[1], [0], [0], [1], [0, 0, 1, 1], [], []>} : vector<2x26xf32>, vector<26x32xf32>, vector<2x32xf32> -> vector<2x32xf32>
    %c0_3 = arith.constant 0 : index
    %c0_4 = arith.constant 0 : index
    %3 = vector.load %arg6[%c0_3, %c0_4] : memref<1x32xf32, #tpu.memory_space<vmem>>, vector<1x32xf32>
    %4 = vector.broadcast %3 : vector<1x32xf32> to vector<2x32xf32>
    %5 = arith.addf %2, %4 : vector<2x32xf32>
    %6 = arith.negf %5 : vector<2x32xf32>
    %7 = math.exp %6 : vector<2x32xf32>
    %cst_5 = arith.constant 1.000000e+00 : f32
    %8 = vector.broadcast %cst_5 : f32 to vector<2x32xf32>
    %9 = arith.addf %8, %7 : vector<2x32xf32>
    %10 = arith.divf %8, %9 : vector<2x32xf32>
    %c0_6 = arith.constant 0 : index
    %c0_7 = arith.constant 0 : index
    %c0_8 = arith.constant 0 : index
    %11 = vector.load %arg0[%c0_6, %c0_7, %c0_8] : memref<2x8x4xf32, #tpu.memory_space<vmem>>, vector<2x8x4xf32>
    %12 = vector.shape_cast %11 : vector<2x8x4xf32> to vector<16x4xf32>
    %c0_9 = arith.constant 0 : index
    %c0_10 = arith.constant 0 : index
    %13 = vector.load %arg2[%c0_9, %c0_10] : memref<4x96xf32, #tpu.memory_space<vmem>>, vector<4x96xf32>
    %cst_11 = arith.constant dense<0.000000e+00> : vector<16x96xf32>
    %14 = tpu.matmul %12, %13, %cst_11 {dimension_numbers = #tpu.dot_dimension_numbers<[1], [0], [0], [1], [0, 0, 1, 1], [], []>} : vector<16x4xf32>, vector<4x96xf32>, vector<16x96xf32> -> vector<16x96xf32>
    %c0_12 = arith.constant 0 : index
    %c0_13 = arith.constant 0 : index
    %15 = vector.load %arg5[%c0_12, %c0_13] : memref<1x96xf32, #tpu.memory_space<vmem>>, vector<1x96xf32>
    %16 = vector.broadcast %15 : vector<1x96xf32> to vector<16x96xf32>
    %17 = arith.addf %14, %16 : vector<16x96xf32>
    %18 = vector.shape_cast %17 : vector<16x96xf32> to vector<2x8x96xf32>
    %c0_14 = arith.constant 0 : index
    %c0_15 = arith.constant 0 : index
    %19 = vector.load %arg3[%c0_14, %c0_15] : memref<32x96xf32, #tpu.memory_space<vmem>>, vector<32x96xf32>
    %cst_16 = arith.constant 0.000000e+00 : f32
    %20 = vector.broadcast %cst_16 : f32 to vector<2x32xf32>
    %cst_17 = arith.constant 0.000000e+00 : f32
    %21 = vector.broadcast %cst_17 : f32 to vector<2x32xf32>
    %cst_18 = arith.constant dense<0.000000e+00> : vector<2x96xf32>
    %22 = tpu.matmul %20, %19, %cst_18 {dimension_numbers = #tpu.dot_dimension_numbers<[1], [0], [0], [1], [0, 0, 1, 1], [], []>} : vector<2x32xf32>, vector<32x96xf32>, vector<2x96xf32> -> vector<2x96xf32>
    %23 = vector.extract_strided_slice %18 {offsets = [0, 0, 0], sizes = [2, 1, 96], strides = [1, 1, 1]} : vector<2x8x96xf32> to vector<2x1x96xf32>
    %24 = vector.shape_cast %23 : vector<2x1x96xf32> to vector<2x96xf32>
    %25 = arith.addf %22, %24 : vector<2x96xf32>
    %26 = vector.extract_strided_slice %25 {offsets = [0, 0], sizes = [2, 32], strides = [1, 1]} : vector<2x96xf32> to vector<2x32xf32>
    %27 = vector.extract_strided_slice %25 {offsets = [0, 32], sizes = [2, 32], strides = [1, 1]} : vector<2x96xf32> to vector<2x32xf32>
    %28 = vector.extract_strided_slice %25 {offsets = [0, 64], sizes = [2, 32], strides = [1, 1]} : vector<2x96xf32> to vector<2x32xf32>
    %29 = arith.negf %26 : vector<2x32xf32>
    %30 = math.exp %29 : vector<2x32xf32>
    %cst_19 = arith.constant 1.000000e+00 : f32
    %31 = vector.broadcast %cst_19 : f32 to vector<2x32xf32>
    %32 = arith.addf %31, %30 : vector<2x32xf32>
    %33 = arith.divf %31, %32 : vector<2x32xf32>
    %34 = arith.mulf %33, %21 : vector<2x32xf32>
    %35 = math.tanh %28 : vector<2x32xf32>
    %36 = arith.mulf %10, %35 : vector<2x32xf32>
    %37 = arith.addf %34, %36 : vector<2x32xf32>
    %38 = arith.negf %27 : vector<2x32xf32>
    %39 = math.exp %38 : vector<2x32xf32>
    %cst_20 = arith.constant 1.000000e+00 : f32
    %40 = vector.broadcast %cst_20 : f32 to vector<2x32xf32>
    %41 = arith.addf %40, %39 : vector<2x32xf32>
    %42 = arith.divf %40, %41 : vector<2x32xf32>
    %43 = math.tanh %37 : vector<2x32xf32>
    %44 = arith.mulf %42, %43 : vector<2x32xf32>
    %c0_21 = arith.constant 0 : index
    %c0_22 = arith.constant 0 : index
    %c0_23 = arith.constant 0 : index
    %45 = vector.load %arg12[%c0_21, %c0_22, %c0_23] : memref<8x2x32xf32, #tpu.memory_space<vmem>>, vector<1x2x32xf32>
    %46 = vector.shape_cast %45 : vector<1x2x32xf32> to vector<2x32xf32>
    %47 = vector.shape_cast %44 : vector<2x32xf32> to vector<1x2x32xf32>
    tpu.vector_store %arg12[%c0_21, %c0_22, %c0_23], %47 {strides = array<i32>} : memref<8x2x32xf32, #tpu.memory_space<vmem>>, vector<1x2x32xf32>,
    %cst_24 = arith.constant dense<0.000000e+00> : vector<2x96xf32>
    %48 = tpu.matmul %44, %19, %cst_24 {dimension_numbers = #tpu.dot_dimension_numbers<[1], [0], [0], [1], [0, 0, 1, 1], [], []>} : vector<2x32xf32>, vector<32x96xf32>, vector<2x96xf32> -> vector<2x96xf32>
    %49 = vector.extract_strided_slice %18 {offsets = [0, 1, 0], sizes = [2, 1, 96], strides = [1, 1, 1]} : vector<2x8x96xf32> to vector<2x1x96xf32>
    %50 = vector.shape_cast %49 : vector<2x1x96xf32> to vector<2x96xf32>
    %51 = arith.addf %48, %50 : vector<2x96xf32>
    %52 = vector.extract_strided_slice %51 {offsets = [0, 0], sizes = [2, 32], strides = [1, 1]} : vector<2x96xf32> to vector<2x32xf32>
    %53 = vector.extract_strided_slice %51 {offsets = [0, 32], sizes = [2, 32], strides = [1, 1]} : vector<2x96xf32> to vector<2x32xf32>
    %54 = vector.extract_strided_slice %51 {offsets = [0, 64], sizes = [2, 32], strides = [1, 1]} : vector<2x96xf32> to vector<2x32xf32>
    %55 = arith.negf %52 : vector<2x32xf32>
    %56 = math.exp %55 : vector<2x32xf32>
    %cst_25 = arith.constant 1.000000e+00 : f32
    %57 = vector.broadcast %cst_25 : f32 to vector<2x32xf32>
    %58 = arith.addf %57, %56 : vector<2x32xf32>
    %59 = arith.divf %57, %58 : vector<2x32xf32>
    %60 = arith.mulf %59, %37 : vector<2x32xf32>
    %61 = math.tanh %54 : vector<2x32xf32>
    %62 = arith.mulf %10, %61 : vector<2x32xf32>
    %63 = arith.addf %60, %62 : vector<2x32xf32>
    %64 = arith.negf %53 : vector<2x32xf32>
    %65 = math.exp %64 : vector<2x32xf32>
    %cst_26 = arith.constant 1.000000e+00 : f32
    %66 = vector.broadcast %cst_26 : f32 to vector<2x32xf32>
    %67 = arith.addf %66, %65 : vector<2x32xf32>
    %68 = arith.divf %66, %67 : vector<2x32xf32>
    %69 = math.tanh %63 : vector<2x32xf32>
    %70 = arith.mulf %68, %69 : vector<2x32xf32>
    %c1 = arith.constant 1 : index
    %c0_27 = arith.constant 0 : index
    %c0_28 = arith.constant 0 : index
    %71 = vector.load %arg12[%c1, %c0_27, %c0_28] : memref<8x2x32xf32, #tpu.memory_space<vmem>>, vector<1x2x32xf32>
    %72 = vector.shape_cast %71 : vector<1x2x32xf32> to vector<2x32xf32>
    %73 = vector.shape_cast %70 : vector<2x32xf32> to vector<1x2x32xf32>
    tpu.vector_store %arg12[%c1, %c0_27, %c0_28], %73 {strides = array<i32>} : memref<8x2x32xf32, #tpu.memory_space<vmem>>, vector<1x2x32xf32>,
    %cst_29 = arith.constant dense<0.000000e+00> : vector<2x96xf32>
    %74 = tpu.matmul %70, %19, %cst_29 {dimension_numbers = #tpu.dot_dimension_numbers<[1], [0], [0], [1], [0, 0, 1, 1], [], []>} : vector<2x32xf32>, vector<32x96xf32>, vector<2x96xf32> -> vector<2x96xf32>
    %75 = vector.extract_strided_slice %18 {offsets = [0, 2, 0], sizes = [2, 1, 96], strides = [1, 1, 1]} : vector<2x8x96xf32> to vector<2x1x96xf32>
    %76 = vector.shape_cast %75 : vector<2x1x96xf32> to vector<2x96xf32>
    %77 = arith.addf %74, %76 : vector<2x96xf32>
    %78 = vector.extract_strided_slice %77 {offsets = [0, 0], sizes = [2, 32], strides = [1, 1]} : vector<2x96xf32> to vector<2x32xf32>
    %79 = vector.extract_strided_slice %77 {offsets = [0, 32], sizes = [2, 32], strides = [1, 1]} : vector<2x96xf32> to vector<2x32xf32>
    %80 = vector.extract_strided_slice %77 {offsets = [0, 64], sizes = [2, 32], strides = [1, 1]} : vector<2x96xf32> to vector<2x32xf32>
    %81 = arith.negf %78 : vector<2x32xf32>
    %82 = math.exp %81 : vector<2x32xf32>
    %cst_30 = arith.constant 1.000000e+00 : f32
    %83 = vector.broadcast %cst_30 : f32 to vector<2x32xf32>
    %84 = arith.addf %83, %82 : vector<2x32xf32>
    %85 = arith.divf %83, %84 : vector<2x32xf32>
    %86 = arith.mulf %85, %63 : vector<2x32xf32>
    %87 = math.tanh %80 : vector<2x32xf32>
    %88 = arith.mulf %10, %87 : vector<2x32xf32>
    %89 = arith.addf %86, %88 : vector<2x32xf32>
    %90 = arith.negf %79 : vector<2x32xf32>
    %91 = math.exp %90 : vector<2x32xf32>
    %cst_31 = arith.constant 1.000000e+00 : f32
    %92 = vector.broadcast %cst_31 : f32 to vector<2x32xf32>
    %93 = arith.addf %92, %91 : vector<2x32xf32>
    %94 = arith.divf %92, %93 : vector<2x32xf32>
    %95 = math.tanh %89 : vector<2x32xf32>
    %96 = arith.mulf %94, %95 : vector<2x32xf32>
    %c2 = arith.constant 2 : index
    %c0_32 = arith.constant 0 : index
    %c0_33 = arith.constant 0 : index
    %97 = vector.load %arg12[%c2, %c0_32, %c0_33] : memref<8x2x32xf32, #tpu.memory_space<vmem>>, vector<1x2x32xf32>
    %98 = vector.shape_cast %97 : vector<1x2x32xf32> to vector<2x32xf32>
    %99 = vector.shape_cast %96 : vector<2x32xf32> to vector<1x2x32xf32>
    tpu.vector_store %arg12[%c2, %c0_32, %c0_33], %99 {strides = array<i32>} : memref<8x2x32xf32, #tpu.memory_space<vmem>>, vector<1x2x32xf32>,
    %cst_34 = arith.constant dense<0.000000e+00> : vector<2x96xf32>
    %100 = tpu.matmul %96, %19, %cst_34 {dimension_numbers = #tpu.dot_dimension_numbers<[1], [0], [0], [1], [0, 0, 1, 1], [], []>} : vector<2x32xf32>, vector<32x96xf32>, vector<2x96xf32> -> vector<2x96xf32>
    %101 = vector.extract_strided_slice %18 {offsets = [0, 3, 0], sizes = [2, 1, 96], strides = [1, 1, 1]} : vector<2x8x96xf32> to vector<2x1x96xf32>
    %102 = vector.shape_cast %101 : vector<2x1x96xf32> to vector<2x96xf32>
    %103 = arith.addf %100, %102 : vector<2x96xf32>
    %104 = vector.extract_strided_slice %103 {offsets = [0, 0], sizes = [2, 32], strides = [1, 1]} : vector<2x96xf32> to vector<2x32xf32>
    %105 = vector.extract_strided_slice %103 {offsets = [0, 32], sizes = [2, 32], strides = [1, 1]} : vector<2x96xf32> to vector<2x32xf32>
    %106 = vector.extract_strided_slice %103 {offsets = [0, 64], sizes = [2, 32], strides = [1, 1]} : vector<2x96xf32> to vector<2x32xf32>
    %107 = arith.negf %104 : vector<2x32xf32>
    %108 = math.exp %107 : vector<2x32xf32>
    %cst_35 = arith.constant 1.000000e+00 : f32
    %109 = vector.broadcast %cst_35 : f32 to vector<2x32xf32>
    %110 = arith.addf %109, %108 : vector<2x32xf32>
    %111 = arith.divf %109, %110 : vector<2x32xf32>
    %112 = arith.mulf %111, %89 : vector<2x32xf32>
    %113 = math.tanh %106 : vector<2x32xf32>
    %114 = arith.mulf %10, %113 : vector<2x32xf32>
    %115 = arith.addf %112, %114 : vector<2x32xf32>
    %116 = arith.negf %105 : vector<2x32xf32>
    %117 = math.exp %116 : vector<2x32xf32>
    %cst_36 = arith.constant 1.000000e+00 : f32
    %118 = vector.broadcast %cst_36 : f32 to vector<2x32xf32>
    %119 = arith.addf %118, %117 : vector<2x32xf32>
    %120 = arith.divf %118, %119 : vector<2x32xf32>
    %121 = math.tanh %115 : vector<2x32xf32>
    %122 = arith.mulf %120, %121 : vector<2x32xf32>
    %c3 = arith.constant 3 : index
    %c0_37 = arith.constant 0 : index
    %c0_38 = arith.constant 0 : index
    %123 = vector.load %arg12[%c3, %c0_37, %c0_38] : memref<8x2x32xf32, #tpu.memory_space<vmem>>, vector<1x2x32xf32>
    %124 = vector.shape_cast %123 : vector<1x2x32xf32> to vector<2x32xf32>
    %125 = vector.shape_cast %122 : vector<2x32xf32> to vector<1x2x32xf32>
    tpu.vector_store %arg12[%c3, %c0_37, %c0_38], %125 {strides = array<i32>} : memref<8x2x32xf32, #tpu.memory_space<vmem>>, vector<1x2x32xf32>,
    %cst_39 = arith.constant dense<0.000000e+00> : vector<2x96xf32>
    %126 = tpu.matmul %122, %19, %cst_39 {dimension_numbers = #tpu.dot_dimension_numbers<[1], [0], [0], [1], [0, 0, 1, 1], [], []>} : vector<2x32xf32>, vector<32x96xf32>, vector<2x96xf32> -> vector<2x96xf32>
    %127 = vector.extract_strided_slice %18 {offsets = [0, 4, 0], sizes = [2, 1, 96], strides = [1, 1, 1]} : vector<2x8x96xf32> to vector<2x1x96xf32>
    %128 = vector.shape_cast %127 : vector<2x1x96xf32> to vector<2x96xf32>
    %129 = arith.addf %126, %128 : vector<2x96xf32>
    %130 = vector.extract_strided_slice %129 {offsets = [0, 0], sizes = [2, 32], strides = [1, 1]} : vector<2x96xf32> to vector<2x32xf32>
    %131 = vector.extract_strided_slice %129 {offsets = [0, 32], sizes = [2, 32], strides = [1, 1]} : vector<2x96xf32> to vector<2x32xf32>
    %132 = vector.extract_strided_slice %129 {offsets = [0, 64], sizes = [2, 32], strides = [1, 1]} : vector<2x96xf32> to vector<2x32xf32>
    %133 = arith.negf %130 : vector<2x32xf32>
    %134 = math.exp %133 : vector<2x32xf32>
    %cst_40 = arith.constant 1.000000e+00 : f32
    %135 = vector.broadcast %cst_40 : f32 to vector<2x32xf32>
    %136 = arith.addf %135, %134 : vector<2x32xf32>
    %137 = arith.divf %135, %136 : vector<2x32xf32>
    %138 = arith.mulf %137, %115 : vector<2x32xf32>
    %139 = math.tanh %132 : vector<2x32xf32>
    %140 = arith.mulf %10, %139 : vector<2x32xf32>
    %141 = arith.addf %138, %140 : vector<2x32xf32>
    %142 = arith.negf %131 : vector<2x32xf32>
    %143 = math.exp %142 : vector<2x32xf32>
    %cst_41 = arith.constant 1.000000e+00 : f32
    %144 = vector.broadcast %cst_41 : f32 to vector<2x32xf32>
    %145 = arith.addf %144, %143 : vector<2x32xf32>
    %146 = arith.divf %144, %145 : vector<2x32xf32>
    %147 = math.tanh %141 : vector<2x32xf32>
    %148 = arith.mulf %146, %147 : vector<2x32xf32>
    %c4 = arith.constant 4 : index
    %c0_42 = arith.constant 0 : index
    %c0_43 = arith.constant 0 : index
    %149 = vector.load %arg12[%c4, %c0_42, %c0_43] : memref<8x2x32xf32, #tpu.memory_space<vmem>>, vector<1x2x32xf32>
    %150 = vector.shape_cast %149 : vector<1x2x32xf32> to vector<2x32xf32>
    %151 = vector.shape_cast %148 : vector<2x32xf32> to vector<1x2x32xf32>
    tpu.vector_store %arg12[%c4, %c0_42, %c0_43], %151 {strides = array<i32>} : memref<8x2x32xf32, #tpu.memory_space<vmem>>, vector<1x2x32xf32>,
    %cst_44 = arith.constant dense<0.000000e+00> : vector<2x96xf32>
    %152 = tpu.matmul %148, %19, %cst_44 {dimension_numbers = #tpu.dot_dimension_numbers<[1], [0], [0], [1], [0, 0, 1, 1], [], []>} : vector<2x32xf32>, vector<32x96xf32>, vector<2x96xf32> -> vector<2x96xf32>
    %153 = vector.extract_strided_slice %18 {offsets = [0, 5, 0], sizes = [2, 1, 96], strides = [1, 1, 1]} : vector<2x8x96xf32> to vector<2x1x96xf32>
    %154 = vector.shape_cast %153 : vector<2x1x96xf32> to vector<2x96xf32>
    %155 = arith.addf %152, %154 : vector<2x96xf32>
    %156 = vector.extract_strided_slice %155 {offsets = [0, 0], sizes = [2, 32], strides = [1, 1]} : vector<2x96xf32> to vector<2x32xf32>
    %157 = vector.extract_strided_slice %155 {offsets = [0, 32], sizes = [2, 32], strides = [1, 1]} : vector<2x96xf32> to vector<2x32xf32>
    %158 = vector.extract_strided_slice %155 {offsets = [0, 64], sizes = [2, 32], strides = [1, 1]} : vector<2x96xf32> to vector<2x32xf32>
    %159 = arith.negf %156 : vector<2x32xf32>
    %160 = math.exp %159 : vector<2x32xf32>
    %cst_45 = arith.constant 1.000000e+00 : f32
    %161 = vector.broadcast %cst_45 : f32 to vector<2x32xf32>
    %162 = arith.addf %161, %160 : vector<2x32xf32>
    %163 = arith.divf %161, %162 : vector<2x32xf32>
    %164 = arith.mulf %163, %141 : vector<2x32xf32>
    %165 = math.tanh %158 : vector<2x32xf32>
    %166 = arith.mulf %10, %165 : vector<2x32xf32>
    %167 = arith.addf %164, %166 : vector<2x32xf32>
    %168 = arith.negf %157 : vector<2x32xf32>
    %169 = math.exp %168 : vector<2x32xf32>
    %cst_46 = arith.constant 1.000000e+00 : f32
    %170 = vector.broadcast %cst_46 : f32 to vector<2x32xf32>
    %171 = arith.addf %170, %169 : vector<2x32xf32>
    %172 = arith.divf %170, %171 : vector<2x32xf32>
    %173 = math.tanh %167 : vector<2x32xf32>
    %174 = arith.mulf %172, %173 : vector<2x32xf32>
    %c5 = arith.constant 5 : index
    %c0_47 = arith.constant 0 : index
    %c0_48 = arith.constant 0 : index
    %175 = vector.load %arg12[%c5, %c0_47, %c0_48] : memref<8x2x32xf32, #tpu.memory_space<vmem>>, vector<1x2x32xf32>
    %176 = vector.shape_cast %175 : vector<1x2x32xf32> to vector<2x32xf32>
    %177 = vector.shape_cast %174 : vector<2x32xf32> to vector<1x2x32xf32>
    tpu.vector_store %arg12[%c5, %c0_47, %c0_48], %177 {strides = array<i32>} : memref<8x2x32xf32, #tpu.memory_space<vmem>>, vector<1x2x32xf32>,
    %cst_49 = arith.constant dense<0.000000e+00> : vector<2x96xf32>
    %178 = tpu.matmul %174, %19, %cst_49 {dimension_numbers = #tpu.dot_dimension_numbers<[1], [0], [0], [1], [0, 0, 1, 1], [], []>} : vector<2x32xf32>, vector<32x96xf32>, vector<2x96xf32> -> vector<2x96xf32>
    %179 = vector.extract_strided_slice %18 {offsets = [0, 6, 0], sizes = [2, 1, 96], strides = [1, 1, 1]} : vector<2x8x96xf32> to vector<2x1x96xf32>
    %180 = vector.shape_cast %179 : vector<2x1x96xf32> to vector<2x96xf32>
    %181 = arith.addf %178, %180 : vector<2x96xf32>
    %182 = vector.extract_strided_slice %181 {offsets = [0, 0], sizes = [2, 32], strides = [1, 1]} : vector<2x96xf32> to vector<2x32xf32>
    %183 = vector.extract_strided_slice %181 {offsets = [0, 32], sizes = [2, 32], strides = [1, 1]} : vector<2x96xf32> to vector<2x32xf32>
    %184 = vector.extract_strided_slice %181 {offsets = [0, 64], sizes = [2, 32], strides = [1, 1]} : vector<2x96xf32> to vector<2x32xf32>
    %185 = arith.negf %182 : vector<2x32xf32>
    %186 = math.exp %185 : vector<2x32xf32>
    %cst_50 = arith.constant 1.000000e+00 : f32
    %187 = vector.broadcast %cst_50 : f32 to vector<2x32xf32>
    %188 = arith.addf %187, %186 : vector<2x32xf32>
    %189 = arith.divf %187, %188 : vector<2x32xf32>
    %190 = arith.mulf %189, %167 : vector<2x32xf32>
    %191 = math.tanh %184 : vector<2x32xf32>
    %192 = arith.mulf %10, %191 : vector<2x32xf32>
    %193 = arith.addf %190, %192 : vector<2x32xf32>
    %194 = arith.negf %183 : vector<2x32xf32>
    %195 = math.exp %194 : vector<2x32xf32>
    %cst_51 = arith.constant 1.000000e+00 : f32
    %196 = vector.broadcast %cst_51 : f32 to vector<2x32xf32>
    %197 = arith.addf %196, %195 : vector<2x32xf32>
    %198 = arith.divf %196, %197 : vector<2x32xf32>
    %199 = math.tanh %193 : vector<2x32xf32>
    %200 = arith.mulf %198, %199 : vector<2x32xf32>
    %c6 = arith.constant 6 : index
    %c0_52 = arith.constant 0 : index
    %c0_53 = arith.constant 0 : index
    %201 = vector.load %arg12[%c6, %c0_52, %c0_53] : memref<8x2x32xf32, #tpu.memory_space<vmem>>, vector<1x2x32xf32>
    %202 = vector.shape_cast %201 : vector<1x2x32xf32> to vector<2x32xf32>
    %203 = vector.shape_cast %200 : vector<2x32xf32> to vector<1x2x32xf32>
    tpu.vector_store %arg12[%c6, %c0_52, %c0_53], %203 {strides = array<i32>} : memref<8x2x32xf32, #tpu.memory_space<vmem>>, vector<1x2x32xf32>,
    %cst_54 = arith.constant dense<0.000000e+00> : vector<2x96xf32>
    %204 = tpu.matmul %200, %19, %cst_54 {dimension_numbers = #tpu.dot_dimension_numbers<[1], [0], [0], [1], [0, 0, 1, 1], [], []>} : vector<2x32xf32>, vector<32x96xf32>, vector<2x96xf32> -> vector<2x96xf32>
    %205 = vector.extract_strided_slice %18 {offsets = [0, 7, 0], sizes = [2, 1, 96], strides = [1, 1, 1]} : vector<2x8x96xf32> to vector<2x1x96xf32>
    %206 = vector.shape_cast %205 : vector<2x1x96xf32> to vector<2x96xf32>
    %207 = arith.addf %204, %206 : vector<2x96xf32>
    %208 = vector.extract_strided_slice %207 {offsets = [0, 0], sizes = [2, 32], strides = [1, 1]} : vector<2x96xf32> to vector<2x32xf32>
    %209 = vector.extract_strided_slice %207 {offsets = [0, 32], sizes = [2, 32], strides = [1, 1]} : vector<2x96xf32> to vector<2x32xf32>
    %210 = vector.extract_strided_slice %207 {offsets = [0, 64], sizes = [2, 32], strides = [1, 1]} : vector<2x96xf32> to vector<2x32xf32>
    %211 = arith.negf %208 : vector<2x32xf32>
    %212 = math.exp %211 : vector<2x32xf32>
    %cst_55 = arith.constant 1.000000e+00 : f32
    %213 = vector.broadcast %cst_55 : f32 to vector<2x32xf32>
    %214 = arith.addf %213, %212 : vector<2x32xf32>
    %215 = arith.divf %213, %214 : vector<2x32xf32>
    %216 = arith.mulf %215, %193 : vector<2x32xf32>
    %217 = math.tanh %210 : vector<2x32xf32>
    %218 = arith.mulf %10, %217 : vector<2x32xf32>
    %219 = arith.addf %216, %218 : vector<2x32xf32>
    %220 = arith.negf %209 : vector<2x32xf32>
    %221 = math.exp %220 : vector<2x32xf32>
    %cst_56 = arith.constant 1.000000e+00 : f32
    %222 = vector.broadcast %cst_56 : f32 to vector<2x32xf32>
    %223 = arith.addf %222, %221 : vector<2x32xf32>
    %224 = arith.divf %222, %223 : vector<2x32xf32>
    %225 = math.tanh %219 : vector<2x32xf32>
    %226 = arith.mulf %224, %225 : vector<2x32xf32>
    %c7 = arith.constant 7 : index
    %c0_57 = arith.constant 0 : index
    %c0_58 = arith.constant 0 : index
    %227 = vector.load %arg12[%c7, %c0_57, %c0_58] : memref<8x2x32xf32, #tpu.memory_space<vmem>>, vector<1x2x32xf32>
    %228 = vector.shape_cast %227 : vector<1x2x32xf32> to vector<2x32xf32>
    %229 = vector.shape_cast %226 : vector<2x32xf32> to vector<1x2x32xf32>
    tpu.vector_store %arg12[%c7, %c0_57, %c0_58], %229 {strides = array<i32>} : memref<8x2x32xf32, #tpu.memory_space<vmem>>, vector<1x2x32xf32>,
    %c0_59 = arith.constant 0 : index
    %c0_60 = arith.constant 0 : index
    %230 = vector.load %arg7[%c0_59, %c0_60] : memref<4x8xf32, #tpu.memory_space<vmem>>, vector<4x8xf32>
    %c0_61 = arith.constant 0 : index
    %c0_62 = arith.constant 0 : index
    %231 = vector.load %arg8[%c0_61, %c0_62] : memref<4x1xf32, #tpu.memory_space<vmem>>, vector<4x1xf32>
    %c0_63 = arith.constant 0 : index
    %c0_64 = arith.constant 0 : index
    %232 = vector.load %arg9[%c0_63, %c0_64] : memref<32x4xf32, #tpu.memory_space<vmem>>, vector<32x4xf32>
    %c0_65 = arith.constant 0 : index
    %c0_66 = arith.constant 0 : index
    %233 = vector.load %arg10[%c0_65, %c0_66] : memref<1x4xf32, #tpu.memory_space<vmem>>, vector<1x4xf32>
    %c0_67 = arith.constant 0 : index
    %c0_68 = arith.constant 0 : index
    %c0_69 = arith.constant 0 : index
    %234 = vector.load %arg12[%c0_67, %c0_68, %c0_69] : memref<8x2x32xf32, #tpu.memory_space<vmem>>, vector<8x1x32xf32>
    %235 = vector.shape_cast %234 : vector<8x1x32xf32> to vector<8x32xf32>
    %cst_70 = arith.constant dense<0.000000e+00> : vector<4x32xf32>
    %236 = tpu.matmul %230, %235, %cst_70 {dimension_numbers = #tpu.dot_dimension_numbers<[1], [0], [0], [1], [0, 0, 1, 1], [], []>} : vector<4x8xf32>, vector<8x32xf32>, vector<4x32xf32> -> vector<4x32xf32>
    %237 = vector.broadcast %231 : vector<4x1xf32> to vector<4x32xf32>
    %238 = arith.addf %236, %237 : vector<4x32xf32>
    %cst_71 = arith.constant dense<0.000000e+00> : vector<4x4xf32>
    %239 = tpu.matmul %238, %232, %cst_71 {dimension_numbers = #tpu.dot_dimension_numbers<[1], [0], [0], [1], [0, 0, 1, 1], [], []>} : vector<4x32xf32>, vector<32x4xf32>, vector<4x4xf32> -> vector<4x4xf32>
    %240 = vector.broadcast %233 : vector<1x4xf32> to vector<4x4xf32>
    %241 = arith.addf %239, %240 : vector<4x4xf32>
    %c0_72 = arith.constant 0 : index
    %c0_73 = arith.constant 0 : index
    %c0_74 = arith.constant 0 : index
    %242 = vector.load %arg11[%c0_72, %c0_73, %c0_74] : memref<2x4x4xf32, #tpu.memory_space<vmem>>, vector<1x4x4xf32>
    %243 = vector.shape_cast %242 : vector<1x4x4xf32> to vector<4x4xf32>
    %244 = vector.shape_cast %241 : vector<4x4xf32> to vector<1x4x4xf32>
    tpu.vector_store %arg11[%c0_72, %c0_73, %c0_74], %244 {strides = array<i32>} : memref<2x4x4xf32, #tpu.memory_space<vmem>>, vector<1x4x4xf32>,
    %c0_75 = arith.constant 0 : index
    %c1_76 = arith.constant 1 : index
    %c0_77 = arith.constant 0 : index
    %245 = vector.load %arg12[%c0_75, %c1_76, %c0_77] : memref<8x2x32xf32, #tpu.memory_space<vmem>>, vector<8x1x32xf32>
    %246 = vector.shape_cast %245 : vector<8x1x32xf32> to vector<8x32xf32>
    %cst_78 = arith.constant dense<0.000000e+00> : vector<4x32xf32>
    %247 = tpu.matmul %230, %246, %cst_78 {dimension_numbers = #tpu.dot_dimension_numbers<[1], [0], [0], [1], [0, 0, 1, 1], [], []>} : vector<4x8xf32>, vector<8x32xf32>, vector<4x32xf32> -> vector<4x32xf32>
    %248 = vector.broadcast %231 : vector<4x1xf32> to vector<4x32xf32>
    %249 = arith.addf %247, %248 : vector<4x32xf32>
    %cst_79 = arith.constant dense<0.000000e+00> : vector<4x4xf32>
    %250 = tpu.matmul %249, %232, %cst_79 {dimension_numbers = #tpu.dot_dimension_numbers<[1], [0], [0], [1], [0, 0, 1, 1], [], []>} : vector<4x32xf32>, vector<32x4xf32>, vector<4x4xf32> -> vector<4x4xf32>
    %251 = vector.broadcast %233 : vector<1x4xf32> to vector<4x4xf32>
    %252 = arith.addf %250, %251 : vector<4x4xf32>
    %c1_80 = arith.constant 1 : index
    %c0_81 = arith.constant 0 : index
    %c0_82 = arith.constant 0 : index
    %253 = vector.load %arg11[%c1_80, %c0_81, %c0_82] : memref<2x4x4xf32, #tpu.memory_space<vmem>>, vector<1x4x4xf32>
    %254 = vector.shape_cast %253 : vector<1x4x4xf32> to vector<4x4xf32>
    %255 = vector.shape_cast %252 : vector<4x4xf32> to vector<1x4x4xf32>
    tpu.vector_store %arg11[%c1_80, %c0_81, %c0_82], %255 {strides = array<i32>} : memref<2x4x4xf32, #tpu.memory_space<vmem>>, vector<1x4x4xf32>,
    return
  }
}

</mosaic_0001>

<bundles_post_ra>
// kernel: ealstm_forward.1
= control target key start
LH: loop header
LB: loop body
LE: loop exit
PB: predicated region body
PF: predicated region fallthrough
CT: control target
= control target key end

     0   :  { %vm152_vm0 = vcmask 1043456   ;;  %vm145_vm1 = vcmask 31744   ;;  %v1775_v4 = vmov 0.0   ;;  %vm55_vm2 = vcmask 1041408   ;;  %s2118_s0 = inlined_call_operand.vmem [shape: f32[2,8,4], index: 0, kind: input, shape index: {}]   ;;  %s2119_s1 = inlined_call_operand.vmem [shape: f32[2,26], index: 1, kind: input, shape index: {}]   ;;  %s2120_s2 = inlined_call_operand.vmem [shape: f32[4,96], index: 2, kind: input, shape index: {}]   ;;  %s2121_s3 = inlined_call_operand.vmem [shape: f32[32,96], index: 3, kind: input, shape index: {}]   ;;  %s2122_s4 = inlined_call_operand.vmem [shape: f32[26,32], index: 4, kind: input, shape index: {}]   ;;  %s2123_s5 = inlined_call_operand.vmem [shape: f32[1,96], index: 5, kind: input, shape index: {}]   ;;  %s2124_s6 = inlined_call_operand.vmem [shape: f32[1,32], index: 6, kind: input, shape index: {}]   ;;  %s2125_s7 = inlined_call_operand.vmem [shape: f32[4,8], index: 7, kind: input, shape index: {}]   ;;  %s2126_s8 = inlined_call_operand.vmem [shape: f32[4,1], index: 8, kind: input, shape index: {}]   ;;  %s2127_s9 = inlined_call_operand.vmem [shape: f32[32,4], index: 9, kind: input, shape index: {}]   ;;  %s2128_s10 = inlined_call_operand.vmem [shape: f32[1,4], index: 10, kind: input, shape index: {}]   ;;  %s2129_s11 = inlined_call_operand.hbm [shape: f32[2,4,4], index: 11, kind: output, shape index: {}]  }
   0x1   :  { %v137_v0 = vld [vmem:[%s2120_s2] sm:$0xf]  ;;  %v136_v2 = vld [vmem:[%s2118_s0 + $0x8] sm:$0xff]  ;;  %v1855_v3 = vld [vmem:[%s2121_s3 + $0x18] sm:$0xff]  ;;  %1540 = vmatprep.subr.mxu0 %v1775_v4  ;;  %vm1776_vm3 = vmmov 0  }
   0x2   :  { %v135_v1 = vld [vmem:[%s2118_s0] sm:$0xff]  ;;  %1551 = vmatprep.subr.msk.mxu1 %vm152_vm0, %v137_v0  ;;  %v43_v5 = vld [vmem:[%s2122_s4 + $0x18] sm:$0x3]  ;;  %v1865_v6 = vld [vmem:[%s2121_s3 + $0x10] sm:$0xff] }
   0x3   :  { %1553 = vmatprep.mubr.msk.f32.mxu1 %vm145_vm1, %v135_v1  ;;  %1552 = vmatpush3.msk.msra.mxu1 %vm152_vm0, %v137_v0  ;;  %v42_v7 = vld [vmem:[%s2122_s4 + $0x10] sm:$0xff] }
   0x4   :  { %1554 = vmatmul.mubr.msk.f32.vlgmr.msra.gmra.mxu1 %vm145_vm1, %v136_v2  ;;  %1556 = vmatprep.subr.mxu1 %v1775_v4 }
   0x5   :  { %1557 = vmatpush3.msra.mxu1 %v1855_v3  ;;  %1564 = vmatprep.mubr.msk.f32.mxu1 %vm1776_vm3, %v1775_v4 }
   0x6   :  { %16 = vsyncpa [#allocation4], 0  ;;  %1558 = vmatprep.subr.mxu1 %v1775_v4  ;;  %v1877_v8 = vld [vmem:[%s2121_s3 + $0x8] sm:$0xff]  ;;  %1541 = vmatpush3.msk.msra.mxu0 %vm55_vm2, %v43_v5  ;;  %v1888_v10 = vld [vmem:[%s2121_s3] sm:$0xff]  ;;  %vm51_vm4 = vcmask 211968   ;;  %vm238_vm5 = vcmask 1041409  }
   0x7   :  { %1559 = vmatpush3.msra.mxu1 %v1865_v6  ;;  %1542 = vmatprep.subr.mxu0 %v1775_v4  ;;  %v41_v9 = vld [vmem:[%s2122_s4 + $0x8] sm:$0xff]  ;;  %v40_v11 = vld [vmem:[%s2122_s4] sm:$0xff]  ;;  %s1777_s4 = smov 64   ;;  %s1779_s21 = smov 96   ;;  %vm339_vm6 = vcmask 254976   ;;  %vm241_vm7 = vcmask 261120  }
   0x8   :  { %1560 = vmatprep.subr.mxu1 %v1775_v4  ;;  %1543 = vmatpush3.msra.mxu0 %v42_v7  ;;  %v39_v12 = vld [vmem:[%s2119_s1] sm:$0x3]  ;;  %vm1085_vm8 = vcmask 1042434   ;;  %vm1088_vm9 = vcmask 1043459   ;;  %vm1091_vm10 = vcmask 1044484   ;;  %vm1094_vm11 = vcmask 1045509  }
   0x9   :  { %1561 = vmatpush3.msra.mxu1 %v1877_v8  ;;  %1544 = vmatprep.subr.mxu0 %v1775_v4  ;;  %v1454_v13 = vld [vmem:[%s2123_s5] ss:$0 sm:$0xff]  ;;  %vm1097_vm12 = vcmask 1046534   ;;  %vm1100_vm13 = vcmask 1047559   ;;  %vm1103_vm14 = vcmask 64512   ;;  %vm1256_vm15 = vcmask 27648  }
   0xa   :  { %1562 = vmatprep.subr.mxu1 %v1775_v4  ;;  %1545 = vmatpush3.msra.mxu0 %v41_v9  ;;  %v1450_v46 = vld [vmem:[%s2124_s6] ss:$0 sm:$0xff]  ;;  %s1778_s6 = smov 32  }
   0xb   :  { %1563 = vmatpush3.msra.mxu1 %v1888_v10  ;;  %1546 = vmatprep.subr.mxu0 %v1775_v4 }
   0xc   :  { %1565 = vmatmul.mubr.f32.vlgmr.msra.gmra.mxu1 %v1775_v4  ;;  %1547 = vmatpush3.msra.mxu0 %v40_v11 }
   0xd   :  { %1548 = vmatprep.mubr.msk.f32.mxu0 %vm1776_vm3, %v1775_v4  ;;  %1567 = vmatprep.subr.mxu0 %v1775_v4 }
   0xe   :  { %1549 = vmatmul.mubr.msk.f32.vlgmr.msra.gmra.mxu0 %vm51_vm4, %v39_v12  ;;  %1578 = vmatprep.subr.mxu1 %v1775_v4 }
   0xf   :  { %1568 = vmatpush3.msra.mxu0 %v1855_v3  ;;  %1575 = vmatprep.mubr.msk.f32.mxu0 %vm1776_vm3, %v1775_v4 }
  0x10   :  { %1569 = vmatprep.subr.mxu0 %v1775_v4  ;;  %1579 = vmatpush3.msra.mxu1 %v1855_v3 }
  0x11   :  { %1570 = vmatpush3.msra.mxu0 %v1865_v6  ;;  %1580 = vmatprep.subr.mxu1 %v1775_v4 }
  0x12   :  { %1571 = vmatprep.subr.mxu0 %v1775_v4  ;;  %1581 = vmatpush3.msra.mxu1 %v1865_v6 }
  0x13   :  { %1572 = vmatpush3.msra.mxu0 %v1877_v8  ;;  %1582 = vmatprep.subr.mxu1 %v1775_v4 }
  0x14   :  { %1573 = vmatprep.subr.mxu0 %v1775_v4  ;;  %1583 = vmatpush3.msra.mxu1 %v1877_v8 }
  0x15   :  { %1574 = vmatpush3.msra.mxu0 %v1888_v10  ;;  %1584 = vmatprep.subr.mxu1 %v1775_v4 }
  0x16   :  { %1585 = vmatpush3.msra.mxu1 %v1888_v10  ;;  %1586 = vmatprep.mubr.msk.f32.mxu1 %vm1776_vm3, %v1775_v4 }
  0x17   :  { %1589 = vmatprep.subr.mxu0 %v1775_v4  ;;  %1600 = vmatprep.subr.mxu1 %v1775_v4 }
  0xc4   :  { %v1555_v14 = vpop.f32.mrf.mxu1 }
  0xc5   :  { %v228_v15 = vadd.f32 %v1555_v14, %v1454_v13 }
  0xc6   :  { %v222_v16 = vpop.f32.mrf.mxu1 }
  0xc7   :  { %v223_v17 = vadd.f32 %v1454_v13, %v222_v16  ;;  %v237_v18 = vrot.slane %v228_v15, 7  ;;  %v443_v19 = vrot.slane %v228_v15, 1  ;;  %v545_v20 = vrot.slane %v228_v15, 2 }
  0xc8   :  { %v647_v21 = vrot.slane %v228_v15, 3  ;;  %v749_v22 = vrot.slane %v228_v15, 4  ;;  %v851_v23 = vrot.slane %v228_v15, 5  ;;  %v953_v24 = vrot.slane %v228_v15, 6 }
  0xc9   :  { %v341_v25 = vrot.slane %v223_v17, 1  ;;  %v442_v26 = vrot.slane %v223_v17, 2  ;;  %v544_v27 = vrot.slane %v223_v17, 3  ;;  %v646_v28 = vrot.slane %v223_v17, 4 }
  0xca   :  { %v748_v29 = vrot.slane %v223_v17, 5  ;;  %v850_v30 = vrot.slane %v223_v17, 6  ;;  %v952_v31 = vrot.slane %v223_v17, 7  ;;  %v239_v32 = vsel %vm238_vm5, %v237_v18, %v223_v17 }
  0xcb   :  { %v342_v33 = vsel %vm238_vm5, %v228_v15, %v341_v25  ;;  %v1932_v34 = vsel %vm238_vm5, %v443_v19, %v442_v26  ;;  %v1935_v35 = vsel %vm238_vm5, %v545_v20, %v544_v27  ;;  %v1938_v37 = vsel %vm238_vm5, %v647_v21, %v646_v28 }
  0xcc   :  { %v311_v36 = vpop.f32.mrf.mxu1  ;;  %v1941_v38 = vsel %vm238_vm5, %v749_v22, %v748_v29  ;;  %v1944_v39 = vsel %vm238_vm5, %v851_v23, %v850_v30  ;;  %v1947_v40 = vsel %vm238_vm5, %v953_v24, %v952_v31 }
  0xcd   :  { %v312_v41 = vadd.f32 %v311_v36, %v239_v32 }
  0xce   :  { %v1566_v42 = vpop.f32.mrf.mxu1  ;;  %v125_v43 = vpop.f32.mrf.mxu0 }
  0xcf   :  { %1685 = vtanh.f32 %v312_v41  ;;  %v126_v47 = vadd.f32 %v1450_v46, %v125_v43  ;;  %v1458_v48 = vmul.f32 -1.442695, %v312_v41 }
  0xd0   :  { %v1550_v44 = vpop.f32.mrf.mxu0 }
  0xd1   :  { %v1453_v49 = vmul.f32 -1.442695, %v126_v47  ;;  %1687 = vpow2.f32 %v1458_v48 }
  0xd3   :  { %1689 = vpow2.f32 %v1453_v49 }
  0xdc   :  { %v1686_v45 = vpop.eup %1685 }
  0xdd   :  { %324 = vrot.lane.b32.xlu0 %v1686_v45, %s1777_s4 }
  0xde   :  { %v1688_v50 = vpop.eup %1687 }
  0xdf   :  { %v318_v52 = vadd.f32 1.0, %v1688_v50 }
  0xe0   :  { %v1690_v51 = vpop.eup %1689 }
  0xe1   :  { %v132_v53 = vadd.f32 1.0, %v1690_v51  ;;  %1691 = vrcp.f32 %v318_v52 }
  0xe3   :  { %1693 = vrcp.f32 %v132_v53 }
  0xee   :  { %v1692_v54 = vpop.eup %1691 }
  0xef   :  { %v321_v57 = vmul.f32 0.0, %v1692_v54 }
  0xf0   :  { %v1953_v55 = vpop.eup %1693 }
 0x14f   :  { %v325_v56 = vpop.permute.xlu0 %324 }
 0x150   :  { %v327_v58 = vmul.f32 %v1953_v55, %v325_v56 }
 0x152   :  { %v328_v59 = vadd.f32 %v327_v58, %v321_v57 }
 0x154   :  { %1695 = vtanh.f32 %v328_v59 }
 0x161   :  { %v1696_v60 = vpop.eup %1695 }
 0x162   :  { %331 = vrot.lane.b32.xlu0 %v1696_v60, %s1778_s6 }
 0x1d4   :  { %v332_v61 = vpop.permute.xlu0 %331 }
 0x1d5   :  { %v334_v62 = vmul.f32 %v1692_v54, %v332_v61 }
 0x1d7   :  { %336 = vrot.lane.b32.xlu1 %v334_v62, %s1779_s21 }
 0x249   :  { %v337_v63 = vpop.permute.xlu1 %336 }
 0x24a   :  { %340 = vst.msk [vmem:[#allocation2] sm:$0x3] %vm339_vm6, %v337_v63  ;;  %1576 = vmatmul.mubr.msk.f32.vlgmr.msra.gmra.mxu0 %vm241_vm7, %v337_v63 }
 0x24b   :  { %1590 = vmatpush3.msra.mxu0 %v1855_v3  ;;  %1597 = vmatprep.mubr.msk.f32.mxu0 %vm1776_vm3, %v1775_v4 }
 0x24c   :  { %1591 = vmatprep.subr.mxu0 %v1775_v4 }
 0x24d   :  { %1592 = vmatpush3.msra.mxu0 %v1865_v6 }
 0x24e   :  { %1593 = vmatprep.subr.mxu0 %v1775_v4 }
 0x24f   :  { %1594 = vmatpush3.msra.mxu0 %v1877_v8 }
 0x250   :  { %1595 = vmatprep.subr.mxu0 %v1775_v4 }
 0x251   :  { %1596 = vmatpush3.msra.mxu0 %v1888_v10  ;;  %v1258_v62 = vld [vmem:[#allocation2 + $0x1] sm:$0x1] }
 0x252   :  { %1611 = vmatprep.subr.mxu0 %v1775_v4 }
 0x30a   :  { %v412_v0 = vpop.f32.mrf.mxu0 }
 0x30b   :  { %v413_v1 = vadd.f32 %v412_v0, %v342_v33 }
 0x30c   :  { %v1577_v2 = vpop.f32.mrf.mxu0 }
 0x30d   :  { %1697 = vtanh.f32 %v413_v1  ;;  %v1460_v7 = vmul.f32 -1.442695, %v413_v1 }
 0x30f   :  { %1699 = vpow2.f32 %v1460_v7 }
 0x31a   :  { %v1698_v5 = vpop.eup %1697 }
 0x31b   :  { %425 = vrot.lane.b32.xlu1 %v1698_v5, %s1777_s4 }
 0x31c   :  { %v1700_v9 = vpop.eup %1699 }
 0x31d   :  { %v419_v11 = vadd.f32 1.0, %v1700_v9 }
 0x31f   :  { %1701 = vrcp.f32 %v419_v11 }
 0x32c   :  { %v1702_v12 = vpop.eup %1701 }
 0x32d   :  { %v422_v14 = vmul.f32 %v1702_v12, %v328_v59 }
 0x38d   :  { %v426_v13 = vpop.permute.xlu1 %425 }
 0x38e   :  { %v428_v15 = vmul.f32 %v1953_v55, %v426_v13 }
 0x390   :  { %v429_v16 = vadd.f32 %v428_v15, %v422_v14 }
 0x392   :  { %1703 = vtanh.f32 %v429_v16 }
 0x39f   :  { %v1704_v17 = vpop.eup %1703 }
 0x3a0   :  { %432 = vrot.lane.b32.xlu0 %v1704_v17, %s1778_s6 }
 0x412   :  { %v433_v18 = vpop.permute.xlu0 %432 }
 0x413   :  { %v435_v19 = vmul.f32 %v1702_v12, %v433_v18 }
 0x415   :  { %437 = vrot.lane.b32.xlu1 %v435_v19, %s1779_s21 }
 0x487   :  { %v438_v20 = vpop.permute.xlu1 %437 }
 0x488   :  { %441 = vst.msk [vmem:[#allocation2 + $0x2] sm:$0x3] %vm339_vm6, %v438_v20  ;;  %1587 = vmatmul.mubr.msk.f32.vlgmr.msra.gmra.mxu1 %vm241_vm7, %v438_v20 }
 0x489   :  { %1601 = vmatpush3.msra.mxu1 %v1855_v3  ;;  %1608 = vmatprep.mubr.msk.f32.mxu1 %vm1776_vm3, %v1775_v4 }
 0x48a   :  { %1602 = vmatprep.subr.mxu1 %v1775_v4 }
 0x48b   :  { %1603 = vmatpush3.msra.mxu1 %v1865_v6 }
 0x48c   :  { %1604 = vmatprep.subr.mxu1 %v1775_v4 }
 0x48d   :  { %1605 = vmatpush3.msra.mxu1 %v1877_v8 }
 0x48e   :  { %1606 = vmatprep.subr.mxu1 %v1775_v4 }
 0x48f   :  { %1607 = vmatpush3.msra.mxu1 %v1888_v10  ;;  %v1259_v58 = vld [vmem:[#allocation2 + $0x3] sm:$0x1] }
 0x490   :  { %1622 = vmatprep.subr.mxu1 %v1775_v4  ;;  %v1274_v60 = vrot.slane %v1259_v58, 7 }
 0x492   :  { %v1275_v0 = vsel %vm238_vm5, %v1274_v60, %v1258_v62 }
 0x548   :  { %v514_v21 = vpop.f32.mrf.mxu1 }
 0x549   :  { %v515_v22 = vadd.f32 %v514_v21, %v1932_v34 }
 0x54a   :  { %v1588_v23 = vpop.f32.mrf.mxu1 }
 0x54b   :  { %1705 = vtanh.f32 %v515_v22  ;;  %v1462_v25 = vmul.f32 -1.442695, %v515_v22 }
 0x54d   :  { %1707 = vpow2.f32 %v1462_v25 }
 0x558   :  { %v1706_v24 = vpop.eup %1705 }
 0x559   :  { %527 = vrot.lane.b32.xlu0 %v1706_v24, %s1777_s4 }
 0x55a   :  { %v1708_v26 = vpop.eup %1707 }
 0x55b   :  { %v521_v27 = vadd.f32 1.0, %v1708_v26 }
 0x55d   :  { %1709 = vrcp.f32 %v521_v27 }
 0x56a   :  { %v1710_v28 = vpop.eup %1709 }
 0x56b   :  { %v524_v30 = vmul.f32 %v1710_v28, %v429_v16 }
 0x5cb   :  { %v528_v29 = vpop.permute.xlu0 %527 }
 0x5cc   :  { %v530_v31 = vmul.f32 %v1953_v55, %v528_v29 }
 0x5ce   :  { %v531_v32 = vadd.f32 %v530_v31, %v524_v30 }
 0x5d0   :  { %1711 = vtanh.f32 %v531_v32 }
 0x5dd   :  { %v1712_v33 = vpop.eup %1711 }
 0x5de   :  { %534 = vrot.lane.b32.xlu1 %v1712_v33, %s1778_s6 }
 0x650   :  { %v535_v34 = vpop.permute.xlu1 %534 }
 0x651   :  { %v537_v36 = vmul.f32 %v1710_v28, %v535_v34 }
 0x653   :  { %539 = vrot.lane.b32.xlu0 %v537_v36, %s1779_s21 }
 0x6c5   :  { %v540_v41 = vpop.permute.xlu0 %539 }
 0x6c6   :  { %543 = vst.msk [vmem:[#allocation2 + $0x4] sm:$0x3] %vm339_vm6, %v540_v41  ;;  %1598 = vmatmul.mubr.msk.f32.vlgmr.msra.gmra.mxu0 %vm241_vm7, %v540_v41 }
 0x6c7   :  { %1612 = vmatpush3.msra.mxu0 %v1855_v3  ;;  %1619 = vmatprep.mubr.msk.f32.mxu0 %vm1776_vm3, %v1775_v4 }
 0x6c8   :  { %1613 = vmatprep.subr.mxu0 %v1775_v4 }
 0x6c9   :  { %1614 = vmatpush3.msra.mxu0 %v1865_v6 }
 0x6ca   :  { %1615 = vmatprep.subr.mxu0 %v1775_v4 }
 0x6cb   :  { %1616 = vmatpush3.msra.mxu0 %v1877_v8 }
 0x6cc   :  { %1617 = vmatprep.subr.mxu0 %v1775_v4 }
 0x6cd   :  { %1618 = vmatpush3.msra.mxu0 %v1888_v10  ;;  %v1260_v59 = vld [vmem:[#allocation2 + $0x5] sm:$0x1] }
 0x6ce   :  { %1633 = vmatprep.subr.mxu0 %v1775_v4  ;;  %v1276_v61 = vrot.slane %v1260_v59, 6 }
 0x6d0   :  { %v1277_v2 = vsel %vm1085_vm8, %v1276_v61, %v1275_v0 }
 0x786   :  { %v616_v42 = vpop.f32.mrf.mxu0 }
 0x787   :  { %v617_v43 = vadd.f32 %v616_v42, %v1935_v35 }
 0x788   :  { %v1599_v44 = vpop.f32.mrf.mxu0 }
 0x789   :  { %1713 = vtanh.f32 %v617_v43  ;;  %v1464_v46 = vmul.f32 -1.442695, %v617_v43 }
 0x78b   :  { %1715 = vpow2.f32 %v1464_v46 }
 0x796   :  { %v1714_v45 = vpop.eup %1713 }
 0x797   :  { %629 = vrot.lane.b32.xlu1 %v1714_v45, %s1777_s4 }
 0x798   :  { %v1716_v47 = vpop.eup %1715 }
 0x799   :  { %v623_v48 = vadd.f32 1.0, %v1716_v47 }
 0x79b   :  { %1717 = vrcp.f32 %v623_v48 }
 0x7a8   :  { %v1718_v49 = vpop.eup %1717 }
 0x7a9   :  { %v626_v51 = vmul.f32 %v1718_v49, %v531_v32 }
 0x809   :  { %v630_v50 = vpop.permute.xlu1 %629 }
 0x80a   :  { %v632_v52 = vmul.f32 %v1953_v55, %v630_v50 }
 0x80c   :  { %v633_v53 = vadd.f32 %v632_v52, %v626_v51 }
 0x80e   :  { %1719 = vtanh.f32 %v633_v53 }
 0x81b   :  { %v1720_v54 = vpop.eup %1719 }
 0x81c   :  { %636 = vrot.lane.b32.xlu0 %v1720_v54, %s1778_s6 }
 0x88e   :  { %v637_v35 = vpop.permute.xlu0 %636 }
 0x88f   :  { %v639_v56 = vmul.f32 %v1718_v49, %v637_v35 }
 0x891   :  { %641 = vrot.lane.b32.xlu1 %v639_v56, %s1779_s21 }
 0x903   :  { %v642_v57 = vpop.permute.xlu1 %641 }
 0x904   :  { %645 = vst.msk [vmem:[#allocation2 + $0x6] sm:$0x3] %vm339_vm6, %v642_v57  ;;  %1609 = vmatmul.mubr.msk.f32.vlgmr.msra.gmra.mxu1 %vm241_vm7, %v642_v57 }
 0x905   :  { %1623 = vmatpush3.msra.mxu1 %v1855_v3  ;;  %1630 = vmatprep.mubr.msk.f32.mxu1 %vm1776_vm3, %v1775_v4 }
 0x906   :  { %1624 = vmatprep.subr.mxu1 %v1775_v4 }
 0x907   :  { %1625 = vmatpush3.msra.mxu1 %v1865_v6 }
 0x908   :  { %1626 = vmatprep.subr.mxu1 %v1775_v4 }
 0x909   :  { %1627 = vmatpush3.msra.mxu1 %v1877_v8 }
 0x90a   :  { %1628 = vmatprep.subr.mxu1 %v1775_v4 }
 0x90b   :  { %1629 = vmatpush3.msra.mxu1 %v1888_v10  ;;  %v1261_v63 = vld [vmem:[#allocation2 + $0x7] sm:$0x1] }
 0x90c   :  { %1644 = vmatprep.subr.mxu1 %v1775_v4  ;;  %v1278_v1 = vrot.slane %v1261_v63, 5 }
 0x90e   :  { %v1279_v5 = vsel %vm1088_vm9, %v1278_v1, %v1277_v2 }
 0x9c4   :  { %v718_v7 = vpop.f32.mrf.mxu1 }
 0x9c5   :  { %v719_v9 = vadd.f32 %v718_v7, %v1938_v37 }
 0x9c6   :  { %v1610_v11 = vpop.f32.mrf.mxu1 }
 0x9c7   :  { %1721 = vtanh.f32 %v719_v9  ;;  %v1466_v13 = vmul.f32 -1.442695, %v719_v9 }
 0x9c9   :  { %1723 = vpow2.f32 %v1466_v13 }
 0x9d4   :  { %v1722_v12 = vpop.eup %1721 }
 0x9d5   :  { %731 = vrot.lane.b32.xlu0 %v1722_v12, %s1777_s4 }
 0x9d6   :  { %v1724_v14 = vpop.eup %1723 }
 0x9d7   :  { %v725_v15 = vadd.f32 1.0, %v1724_v14 }
 0x9d9   :  { %1725 = vrcp.f32 %v725_v15 }
 0x9e6   :  { %v1726_v16 = vpop.eup %1725 }
 0x9e7   :  { %v728_v18 = vmul.f32 %v1726_v16, %v633_v53 }
 0xa47   :  { %v732_v17 = vpop.permute.xlu0 %731 }
 0xa48   :  { %v734_v19 = vmul.f32 %v1953_v55, %v732_v17 }
 0xa4a   :  { %v735_v20 = vadd.f32 %v734_v19, %v728_v18  ;;  %v1055_v19 = vld [vmem:[%s2126_s8] sm:$0xf] }
 0xa4c   :  { %1727 = vtanh.f32 %v735_v20 }
 0xa59   :  { %v1728_v21 = vpop.eup %1727 }
 0xa5a   :  { %738 = vrot.lane.b32.xlu1 %v1728_v21, %s1778_s6  ;;  %v1059_v21 = vld [vmem:[%s2127_s9 + $0x18] sm:$0xff] }
 0xacc   :  { %v739_v37 = vpop.permute.xlu1 %738 }
 0xacd   :  { %v741_v22 = vmul.f32 %v1726_v16, %v739_v37  ;;  %v1057_v37 = vld [vmem:[%s2127_s9 + $0x8] sm:$0xff] }
 0xacf   :  { %743 = vrot.lane.b32.xlu0 %v741_v22, %s1779_s21  ;;  %v1062_v22 = vld [vmem:[#allocation2 + $0x2] sm:$0x1] }
 0xb41   :  { %v744_v23 = vpop.permute.xlu0 %743 }
 0xb42   :  { %747 = vst.msk [vmem:[#allocation2 + $0x8] sm:$0x3] %vm339_vm6, %v744_v23  ;;  %1620 = vmatmul.mubr.msk.f32.vlgmr.msra.gmra.mxu0 %vm241_vm7, %v744_v23  ;;  %v1063_v23 = vld [vmem:[#allocation2 + $0x4] sm:$0x1] }
 0xb43   :  { %1634 = vmatpush3.msra.mxu0 %v1855_v3  ;;  %1641 = vmatprep.mubr.msk.f32.mxu0 %vm1776_vm3, %v1775_v4 }
 0xb44   :  { %1635 = vmatprep.subr.mxu0 %v1775_v4 }
 0xb45   :  { %1636 = vmatpush3.msra.mxu0 %v1865_v6 }
 0xb46   :  { %1637 = vmatprep.subr.mxu0 %v1775_v4 }
 0xb47   :  { %1638 = vmatpush3.msra.mxu0 %v1877_v8 }
 0xb48   :  { %1639 = vmatprep.subr.mxu0 %v1775_v4 }
 0xb49   :  { %1640 = vmatpush3.msra.mxu0 %v1888_v10  ;;  %v1262_v24 = vld [vmem:[#allocation2 + $0x9] sm:$0x1] }
 0xb4a   :  { %v1280_v25 = vrot.slane %v1262_v24, 4  ;;  %1665 = vmatprep.subr.mxu0 %v1775_v4 }
 0xb4c   :  { %v1281_v3 = vsel %vm1091_vm10, %v1280_v25, %v1279_v5  ;;  %v1064_v25 = vld [vmem:[#allocation2 + $0x6] sm:$0x1] }
 0xc02   :  { %v820_v26 = vpop.f32.mrf.mxu0 }
 0xc03   :  { %v821_v27 = vadd.f32 %v820_v26, %v1941_v38  ;;  %v1082_v26 = vrot.slane %v1062_v22, 7 }
 0xc04   :  { %v1621_v28 = vpop.f32.mrf.mxu0 }
 0xc05   :  { %1729 = vtanh.f32 %v821_v27  ;;  %v1468_v8 = vmul.f32 -1.442695, %v821_v27  ;;  %v1084_v28 = vrot.slane %v1063_v23, 6 }
 0xc07   :  { %1731 = vpow2.f32 %v1468_v8  ;;  %v1087_v8 = vrot.slane %v1064_v25, 5 }
 0xc12   :  { %v1730_v6 = vpop.eup %1729 }
 0xc13   :  { %833 = vrot.lane.b32.xlu1 %v1730_v6, %s1777_s4 }
 0xc14   :  { %v1732_v29 = vpop.eup %1731 }
 0xc15   :  { %v827_v30 = vadd.f32 1.0, %v1732_v29  ;;  %v1061_v29 = vld [vmem:[#allocation2] sm:$0x1] }
 0xc17   :  { %1733 = vrcp.f32 %v827_v30 }
 0xc24   :  { %v1734_v10 = vpop.eup %1733 }
 0xc25   :  { %v830_v32 = vmul.f32 %v1734_v10, %v735_v20  ;;  %v1780_v20 = vmov 0  }
 0xc26   :  { %1684 = vset.pattern.permute.xlu0 %v1780_v20 }
 0xc85   :  { %v834_v31 = vpop.permute.xlu1 %833 }
 0xc86   :  { %v836_v33 = vmul.f32 %v1953_v55, %v834_v31 }
 0xc88   :  { %v837_v34 = vadd.f32 %v836_v33, %v830_v32 }
 0xc8a   :  { %1735 = vtanh.f32 %v837_v34 }
 0xc97   :  { %v1736_v36 = vpop.eup %1735 }
 0xc98   :  { %840 = vrot.lane.b32.xlu0 %v1736_v36, %s1778_s6 }
 0xd0a   :  { %v841_v38 = vpop.permute.xlu0 %840 }
 0xd0b   :  { %v843_v41 = vmul.f32 %v1734_v10, %v841_v38  ;;  %v1083_v10 = vsel %vm238_vm5, %v1082_v26, %v1061_v29 }
 0xd0c   :  { %v1086_v32 = vsel %vm1085_vm8, %v1084_v28, %v1083_v10 }
 0xd0d   :  { %845 = vrot.lane.b32.xlu1 %v843_v41, %s1779_s21 }
 0xd7f   :  { %v846_v42 = vpop.permute.xlu1 %845 }
 0xd80   :  { %849 = vst.msk [vmem:[#allocation2 + $0xa] sm:$0x3] %vm339_vm6, %v846_v42  ;;  %1631 = vmatmul.mubr.msk.f32.vlgmr.msra.gmra.mxu1 %vm241_vm7, %v846_v42 }
 0xd81   :  { %1646 = vmatprep.mubr.msk.f32.mxu1 %vm1776_vm3, %v1775_v4 }
 0xd87   :  { %v1263_v43 = vld [vmem:[#allocation2 + $0xb] sm:$0x1]  ;;  %v1066_v27 = vld [vmem:[#allocation2 + $0xa] sm:$0x1] }
 0xd88   :  { %v1282_v44 = vrot.slane %v1263_v43, 3  ;;  %v1093_v31 = vrot.slane %v1066_v27, 3 }
 0xd8a   :  { %v1283_v45 = vsel %vm1094_vm11, %v1282_v44, %v1281_v3  ;;  %v1065_v3 = vld [vmem:[#allocation2 + $0x8] sm:$0x1] }
 0xd8b   :  { %v1090_v30 = vrot.slane %v1065_v3, 4 }
 0xe40   :  { %v922_v46 = vpop.f32.mrf.mxu1 }
 0xe41   :  { %v923_v47 = vadd.f32 %v922_v46, %v1944_v39  ;;  %v1054_v46 = vld [vmem:[%s2125_s7] sm:$0xf] }
 0xe42   :  { %v1632_v48 = vpop.f32.mrf.mxu1 }
 0xe43   :  { %1737 = vtanh.f32 %v923_v47  ;;  %v1470_v50 = vmul.f32 -1.442695, %v923_v47 }
 0xe45   :  { %1739 = vpow2.f32 %v1470_v50 }
 0xe50   :  { %v1738_v49 = vpop.eup %1737 }
 0xe51   :  { %935 = vrot.lane.b32.xlu0 %v1738_v49, %s1777_s4  ;;  %v1056_v49 = vld [vmem:[%s2127_s9] sm:$0xff] }
 0xe52   :  { %v1740_v51 = vpop.eup %1739 }
 0xe53   :  { %v929_v52 = vadd.f32 1.0, %v1740_v51 }
 0xe55   :  { %1741 = vrcp.f32 %v929_v52 }
 0xe62   :  { %v1742_v53 = vpop.eup %1741 }
 0xe63   :  { %v932_v35 = vmul.f32 %v1742_v53, %v837_v34  ;;  %v1089_v34 = vsel %vm1088_vm9, %v1087_v8, %v1086_v32 }
 0xe64   :  { %v1092_v38 = vsel %vm1091_vm10, %v1090_v30, %v1089_v34 }
 0xe65   :  { %v1095_v42 = vsel %vm1094_vm11, %v1093_v31, %v1092_v38 }
 0xec3   :  { %v936_v54 = vpop.permute.xlu0 %935 }
 0xec4   :  { %v938_v56 = vmul.f32 %v1953_v55, %v936_v54  ;;  %v1474_v54 = vld [vmem:[%s2128_s10] ss:$0 sm:$0xff] }
 0xec6   :  { %v939_v57 = vadd.f32 %v938_v56, %v932_v35 }
 0xec8   :  { %1743 = vtanh.f32 %v939_v57 }
 0xed5   :  { %v1744_v58 = vpop.eup %1743 }
 0xed6   :  { %942 = vrot.lane.b32.xlu1 %v1744_v58, %s1778_s6 }
 0xf48   :  { %v943_v39 = vpop.permute.xlu1 %942 }
 0xf49   :  { %v945_v59 = vmul.f32 %v1742_v53, %v943_v39 }
 0xf4b   :  { %947 = vrot.lane.b32.xlu0 %v945_v59, %s1779_s21 }
 0xfbd   :  { %v948_v60 = vpop.permute.xlu0 %947 }
 0xfbe   :  { %951 = vst.msk [vmem:[#allocation2 + $0xc] sm:$0x3] %vm339_vm6, %v948_v60  ;;  %1642 = vmatmul.mubr.msk.f32.vlgmr.msra.gmra.mxu0 %vm241_vm7, %v948_v60 }
 0xfbf   :  { %1673 = vmatprep.mubr.msk.f32.mxu0 %vm1776_vm3, %v1775_v4  ;;  %1666 = vmatpush3.msra.mxu0 %v1059_v21 }
 0xfc0   :  { %1667 = vmatprep.subr.mxu0 %v1775_v4 }
 0xfc5   :  { %v1264_v61 = vld [vmem:[#allocation2 + $0xd] sm:$0x1]  ;;  %v1067_v6 = vld [vmem:[#allocation2 + $0xc] sm:$0x1] }
 0xfc6   :  { %v1284_v62 = vrot.slane %v1264_v61, 2  ;;  %v1096_v33 = vrot.slane %v1067_v6, 2 }
 0xfc8   :  { %v2061_v63 = vsel %vm1097_vm12, %v1284_v62, %v1283_v45  ;;  %v1098_v45 = vsel %vm1097_vm12, %v1096_v33, %v1095_v42 }
0x107e   :  { %v1024_v0 = vpop.f32.mrf.mxu0 }
0x107f   :  { %v1025_v1 = vadd.f32 %v1024_v0, %v1947_v40 }
0x1080   :  { %v1643_v2 = vpop.f32.mrf.mxu0 }
0x1081   :  { %1745 = vtanh.f32 %v1025_v1  ;;  %v1472_v7 = vmul.f32 -1.442695, %v1025_v1 }
0x1083   :  { %1747 = vpow2.f32 %v1472_v7 }
0x108e   :  { %v1746_v5 = vpop.eup %1745 }
0x108f   :  { %1037 = vrot.lane.b32.xlu1 %v1746_v5, %s1777_s4 }
0x1090   :  { %v1748_v9 = vpop.eup %1747 }
0x1091   :  { %v1031_v11 = vadd.f32 1.0, %v1748_v9 }
0x1093   :  { %1749 = vrcp.f32 %v1031_v11 }
0x10a0   :  { %v1750_v12 = vpop.eup %1749 }
0x10a1   :  { %v1034_v14 = vmul.f32 %v1750_v12, %v939_v57 }
0x1101   :  { %v1038_v13 = vpop.permute.xlu1 %1037 }
0x1102   :  { %v1040_v15 = vmul.f32 %v1953_v55, %v1038_v13  ;;  %v1058_v55 = vld [vmem:[%s2127_s9 + $0x10] sm:$0xff]  ;;  %s1781_s9 = smov [#allocation3]  }
0x1103   :  { %1668 = vmatpush3.msra.mxu0 %v1058_v55  ;;  %s1439_s13 = sshll.u32 %s1781_s9, 4  ;;  %s1440_s13 = int_to_ptr.vmem [resolvable:$true] %s1439_s13 }
0x1104   :  { %v1041_v16 = vadd.f32 %v1040_v15, %v1034_v14  ;;  %1669 = vmatprep.subr.mxu0 %v1775_v4  ;;  %s1753_s14 = scalar_lea.vmem %s1440_s13, 128  ;;  %p1758_p1 = scmp.lt.s32.totalorder %s1440_s13, %s1440_s13 }
0x1105   :  { %1670 = vmatpush3.msra.mxu0 %v1057_v37  ;;  %p1754_p0 = scmp.ne.s32.totalorder %s1440_s13, %s1753_s14  ;;  %p1759_p2 = scmp.lt.s32.totalorder %s1753_s14, %s1753_s14 }
0x1106   :  { %1751 = vtanh.f32 %v1041_v16  ;;  %1671 = vmatprep.subr.mxu0 %v1775_v4 }
0x1107   :  { %1672 = vmatpush3.msra.mxu0 %v1056_v49  ;;  %p1760_p3 = por %p1759_p2, %p1758_p1 }
0x1109   :  { %p1761_p4 = pnand %p1760_p3, %p1754_p0 }
0x1113   :  { %v1752_v17 = vpop.eup %1751 }
0x1114   :  { %1044 = vrot.lane.b32.xlu0 %v1752_v17, %s1778_s6 }
0x1118   :  { %1071 = vperm.xlu0 %1684, %v1055_v19  }
0x1186   :  { %v1045_v40 = vpop.permute.xlu0 %1044 }
0x1187   :  { %v1047_v18 = vmul.f32 %v1750_v12, %v1045_v40 }
0x1189   :  { %1049 = vrot.lane.b32.xlu1 %v1047_v18, %s1779_s21 }
0x1193   :  { %v1072_v50 = vpop.permute.xlu0 %1071 }
0x11fb   :  { %v1050_v24 = vpop.permute.xlu1 %1049 }
0x11fc   :  { %1053 = vst.msk [vmem:[#allocation2 + $0xe] sm:$0x3] %vm339_vm6, %v1050_v24 }
0x1203   :  { %v1068_v36 = vld [vmem:[#allocation2 + $0xe] sm:$0x1]  ;;  %v1265_v41 = vld [vmem:[#allocation2 + $0xf] sm:$0x1] }
0x1204   :  { %v1099_v43 = vrot.slane %v1068_v36, 1  ;;  %v1286_v44 = vrot.slane %v1265_v41, 1 }
0x1206   :  { %v1101_v47 = vsel %vm1100_vm13, %v1099_v43, %v1098_v45  ;;  %v1287_v48 = vsel %vm1100_vm13, %v1286_v44, %v2061_v63 }
0x1207   :  { %1645 = vmatpush3.msra.mxu1 %v1101_v47 }
0x1208   :  { %1647 = vmatmul.mubr.msk.f32.vlgmr.msra.gmra.mxu1 %vm1103_vm14, %v1054_v46  ;;  %1649 = vmatprep.subr.mxu1 %v1775_v4 }
0x1209   :  { %1650 = vmatpush3.msra.mxu1 %v1059_v21  ;;  %1657 = vmatprep.mubr.msk.f32.mxu1 %vm1776_vm3, %v1775_v4 }
0x120a   :  { %1651 = vmatprep.subr.mxu1 %v1775_v4 }
0x120b   :  { %1652 = vmatpush3.msra.mxu1 %v1058_v55 }
0x120c   :  { %1653 = vmatprep.subr.mxu1 %v1775_v4 }
0x120d   :  { %1654 = vmatpush3.msra.mxu1 %v1057_v37 }
0x120e   :  { %1655 = vmatprep.subr.mxu1 %v1775_v4 }
0x120f   :  { %1656 = vmatpush3.msra.mxu1 %v1056_v49 }
0x1210   :  { %1660 = vmatprep.subr.mxu1 %v1775_v4 }
0x12c8   :  { %v1173_v51 = vpop.f32.mrf.mxu1 }
0x12c9   :  { %v1174_v52 = vadd.f32 %v1173_v51, %v1072_v50 }
0x12ca   :  { %v1648_v53 = vpop.f32.mrf.mxu1 }
0x12cb   :  { %1658 = vmatmul.mubr.msk.f32.vlgmr.msra.gmra.mxu1 %vm241_vm7, %v1174_v52 }
0x12cc   :  { %1661 = vmatpush3.msra.mxu1 %v1287_v48  ;;  %1662 = vmatprep.mubr.msk.f32.mxu1 %vm1776_vm3, %v1775_v4 }
0x12cf   :  { %1663 = vmatmul.mubr.msk.f32.vlgmr.msra.gmra.mxu1 %vm1103_vm14, %v1054_v46 }
0x138b   :  { %v1252_v35 = vpop.f32.mrf.mxu1 }
0x138c   :  { %v1253_v56 = vadd.f32 %v1474_v54, %v1252_v35 }
0x138d   :  { %v1659_v57 = vpop.f32.mrf.mxu1 }
0x138e   :  { %1257 = vst.msk [vmem:[#allocation3] sm:$0xf] %vm1256_vm15, %v1253_v56 }
0x138f   :  { %v1355_v58 = vpop.f32.mrf.mxu1 }
0x1390   :  { %v1356_v39 = vadd.f32 %v1355_v58, %v1072_v50 }
0x1391   :  { %v1664_v59 = vpop.f32.mrf.mxu1 }
0x1392   :  { %1674 = vmatmul.mubr.msk.f32.vlgmr.msra.gmra.mxu0 %vm241_vm7, %v1356_v39 }
0x1452   :  { %v1428_v60 = vpop.f32.mrf.mxu0 }
0x1453   :  { %v1429_v4 = vadd.f32 %v1474_v54, %v1428_v60 }
0x1454   :  { %v1675_v61 = vpop.f32.mrf.mxu0 }
0x1455   :  { %1433 = vst.msk [vmem:[#allocation3 + $0x4] sm:$0xf] %vm1256_vm15, %v1429_v4 }
0x1456   :  { %1764 = shalt.err (!%p1761_p4)
}
0x1457   :  { %s1782_s10 = smov 4  }
0x1458   :  { %1445 = dma.vmem_to_hbm [thread:$0]  %s1440_s13, 128, %s2129_s11, [#allocation4], %s1777_s4, %s1777_s4, %s1782_s10  }
0x1459   :  { %1773 = dma.done.wait [#allocation4], 128  }
0x145a   :  { %1774 = vsyncadd [#allocation4], 4294967168 }
0x145b   :  { %1449 = vsyncpa [#allocation4], 1 }

</bundles_post_ra>
